<compile_context>
chip_gen: v6e
topology: v6e:2x2x1
jax: 0.10.0
libtpu: 0.0.40
codegen_flags: <defaults>
</compile_context>

<pallas_src>
import functools

import jax
import jax.numpy as jnp
from jax import lax
from jax.experimental import pallas as pl
from jax.experimental.pallas import tpu as pltpu

BN_EPS = 1e-5
LRELU_SLOPE = 0.2
COMPUTE_DTYPE = jnp.bfloat16

_BUDGET_CACHE = None


def _tpu_budget():
    """(tm_max, vmem_limit_bytes) per TPU generation.

    128-MiB-VMEM parts (v5e/v6e): 1024-row tiles, 96 MiB scoped limit.
    64-MiB parts (v7x) / unknown: 512-row tiles, 48 MiB (headroom for compiler
    scratch + semaphores).
    """
    global _BUDGET_CACHE
    if _BUDGET_CACHE is None:
        vmem_bytes = 64 * 1024 * 1024
        try:
            vmem_bytes = int(pltpu.get_tpu_info().vmem_capacity_bytes)
        except Exception:
            pass
        if vmem_bytes >= 128 * 1024 * 1024:
            _BUDGET_CACHE = (1024, 96 * 1024 * 1024)
        else:
            _BUDGET_CACHE = (512, 48 * 1024 * 1024)
    return _BUDGET_CACHE


def _round_up(x, m):
    return ((x + m - 1) // m) * m


def _m_tiling(m):
    """Pick an M tile (multiple of 128, <= tm_max) and the padded M."""
    tm_max, _ = _tpu_budget()
    tm = min(tm_max, _round_up(m, 128))
    grid_m = -(-m // tm)
    return tm, grid_m, tm * grid_m


# ----------------------------- Pallas kernels -----------------------------

def _conv_bias_act_kernel(p_ref, w_ref, b_ref, o_ref, *, use_act):
    # (TM, K) @ (K, Cout) on the MXU, f32 accumulation; bias + LeakyReLU on the VPU.
    y = jnp.dot(p_ref[...], w_ref[...], preferred_element_type=jnp.float32)
    y = y + b_ref[...]
    if use_act:
        y = jnp.where(y > 0, y, LRELU_SLOPE * y)           # LeakyReLU(0.2)
    o_ref[...] = y.astype(o_ref.dtype)


def _conv_stats_kernel(p_ref, w_ref, y_ref, psum_ref, psq_ref):
    # Pass 1 of Conv+BN+LReLU: matmul + per-tile partial sum / sum-of-squares.
    # No cross-tile scratch: each grid step writes its own (1, Cout) row, so the
    # M axis stays "parallel" (v7x: both TensorCores).  Conv bias omitted here:
    # training-mode BN subtracts the batch mean, cancelling it exactly.
    y = jnp.dot(p_ref[...], w_ref[...], preferred_element_type=jnp.float32)
    y_ref[...] = y.astype(y_ref.dtype)
    psum_ref[...] = jnp.sum(y, axis=0, keepdims=True)
    psq_ref[...] = jnp.sum(y * y, axis=0, keepdims=True)


def _scale_shift_act_kernel(y_ref, s_ref, t_ref, o_ref):
    # Pass 2: y * scale + shift (BN folded to one FMA) + LeakyReLU(0.2), f32 math.
    y = y_ref[...].astype(jnp.float32) * s_ref[...] + t_ref[...]
    y = jnp.where(y > 0, y, LRELU_SLOPE * y)
    o_ref[...] = y.astype(o_ref.dtype)


def _convT_bias_kernel(pT_ref, w_ref, b_ref, o_ref):
    # Lane-dense layout for tiny-Cout convs (the final Cout=1 layer):
    #   (Cout, K) @ (K, TM) -> (Cout, TM): M sits in lanes -> unmasked vst.
    y = jnp.dot(w_ref[...], pT_ref[...], preferred_element_type=jnp.float32)
    o_ref[...] = y + b_ref[...]


def _avgpool_kernel(p_ref, o_ref, *, tm, ho, wo, h, w):
    # AvgPool2d(3, stride=2, padding=1, count_include_pad=False), lane-dense (C, M).
    # p_ref: (9, C, TM) tap-major zero-padded patches -> 9 contiguous (C, TM) adds.
    # Valid-count denominator computed analytically; exact divide (counts 4/6/9).
    acc = p_ref[0].astype(jnp.float32)
    for k in range(1, 9):
        acc = acc + p_ref[k].astype(jnp.float32)

    col = pl.program_id(0) * tm + lax.broadcasted_iota(jnp.int32, (1, tm), 1)
    colf = col.astype(jnp.float32)                # exact for M < 2**24
    q1 = jnp.floor(colf / wo)
    ow = colf - q1 * wo                           # col %  Wo
    oh = q1 - jnp.floor(q1 / ho) * ho             # (col // Wo) % Ho
    h0 = jnp.maximum(2.0 * oh - 1.0, 0.0)
    h1 = jnp.minimum(2.0 * oh + 1.0, float(h - 1))
    w0 = jnp.maximum(2.0 * ow - 1.0, 0.0)
    w1 = jnp.minimum(2.0 * ow + 1.0, float(w - 1))
    cnt = (h1 - h0 + 1.0) * (w1 - w0 + 1.0)
    o_ref[...] = (acc / cnt).astype(o_ref.dtype)


# ----------------------------- glue (im2col etc.) -----------------------------

def _conv_taps(x_nhwc, kh, kw, stride, pad):
    """List of kh*kw tap arrays, each (N, Ho, Wo, C), plus dims."""
    x_pad = jnp.pad(x_nhwc, ((0, 0), (pad, pad), (pad, pad), (0, 0)))
    N, Hp, Wp, C = x_pad.shape
    Ho = (Hp - kh) // stride + 1
    Wo = (Wp - kw) // stride + 1
    taps = [x_pad[:, dy:dy + stride * Ho:stride, dx:dx + stride * Wo:stride, :]
            for dy in range(kh) for dx in range(kw)]
    return taps, (N, Ho, Wo, C)


def _patches_mk(taps, dims):
    """(M, K) patches, tap-major / channel-minor K ordering."""
    N, Ho, Wo, C = dims
    T = len(taps)
    p = jnp.stack(taps, axis=3)                          # (N, Ho, Wo, T, C)
    return p.reshape(N * Ho * Wo, T * C)


def _patches_km(taps, dims):
    """(K, M) transposed patches, same K ordering (for lane-dense outputs)."""
    N, Ho, Wo, C = dims
    T = len(taps)
    p = jnp.stack(taps, axis=0)                          # (T, N, Ho, Wo, C)
    p = jnp.moveaxis(p, -1, 1)                           # (T, C, N, Ho, Wo)
    return p.reshape(T * C, N * Ho * Wo)


def conv_layer(x_nhwc, w, b, gb, stride, use_act):
    """Conv2d(k=4, p=2, stride) [+ BatchNorm(train)] [+ LeakyReLU]; NHWC bf16 out."""
    Cout, Cin, kh, kw = w.shape
    taps, (N, Ho, Wo, _) = _conv_taps(x_nhwc, kh, kw, stride, pad=2)
    # TODO(synk): in-kernel patch construction (pl.ANY input + manual DMA) to
    # remove the im2col materialization on the stride-1 layers.
    patches = _patches_mk(taps, (N, Ho, Wo, Cin)).astype(COMPUTE_DTYPE)
    M, K = patches.shape
    tm, grid_m, m_pad = _m_tiling(M)
    if m_pad != M:
        patches = jnp.pad(patches, ((0, m_pad - M), (0, 0)))   # zero rows: no effect on stats
    # PyTorch weight (Cout, Cin, kh, kw) -> (kh*kw*Cin, Cout) matching patch order.
    w_mat = jnp.transpose(w, (2, 3, 1, 0)).reshape(K, Cout).astype(COMPUTE_DTYPE)

    _, vmem_limit = _tpu_budget()
    isz = jnp.dtype(COMPUTE_DTYPE).itemsize
    mm_cost = pl.CostEstimate(
        flops=2 * m_pad * K * Cout, transcendentals=0,
        bytes_accessed=m_pad * K * isz + K * Cout * isz + m_pad * Cout * isz)
    cparams = pltpu.CompilerParams(
        dimension_semantics=("parallel",), vmem_limit_bytes=vmem_limit)

    p_spec = pl.BlockSpec((tm, K), lambda i: (i, 0))
    w_spec = pl.BlockSpec((K, Cout), lambda i: (0, 0))
    row_spec = pl.BlockSpec((1, Cout), lambda i: (0, 0))
    y_spec = pl.BlockSpec((tm, Cout), lambda i: (i, 0))

    if gb is None:
        kern = functools.partial(_conv_bias_act_kernel, use_act=use_act)
        y = pl.pallas_call(
            kern,
            grid=(grid_m,),
            in_specs=[p_spec, w_spec, row_spec],
            out_specs=y_spec,
            out_shape=jax.ShapeDtypeStruct((m_pad, Cout), COMPUTE_DTYPE),
            compiler_params=cparams,
            cost_estimate=mm_cost,
        )(patches, w_mat, b.reshape(1, Cout).astype(jnp.float32))
    else:
        gamma, beta = gb
        stat_spec = pl.BlockSpec((1, Cout), lambda i: (i, 0))
        y_pre, psum, psq = pl.pallas_call(
            _conv_stats_kernel,
            grid=(grid_m,),
            in_specs=[p_spec, w_spec],
            out_specs=[y_spec, stat_spec, stat_spec],
            out_shape=(jax.ShapeDtypeStruct((m_pad, Cout), COMPUTE_DTYPE),
                       jax.ShapeDtypeStruct((grid_m, Cout), jnp.float32),
                       jax.ShapeDtypeStruct((grid_m, Cout), jnp.float32)),
            compiler_params=cparams,
            cost_estimate=mm_cost,
        )(patches, w_mat)

        # Combine per-tile partials (Chan et al.) in plain JAX on tiny arrays.
        # Padded zero rows contribute 0 to both sums; per-tile valid counts are
        # used so the last (partially padded) tile stays exact.
        cnt = jnp.full((grid_m, 1), float(tm), jnp.float32)
        cnt = cnt.at[grid_m - 1, 0].set(float(M - (grid_m - 1) * tm))
        mean_t = psum / cnt
        m2_t = jnp.maximum(psq - psum * mean_t, 0.0)        # per-tile centered SS
        mean = jnp.sum(psum, axis=0, keepdims=True) / M
        var = (jnp.sum(m2_t, axis=0, keepdims=True)
               + jnp.sum(cnt * (mean_t - mean) ** 2, axis=0, keepdims=True)) / M
        scale = gamma.reshape(1, Cout).astype(jnp.float32) * lax.rsqrt(var + BN_EPS)
        shift = beta.reshape(1, Cout).astype(jnp.float32) - mean * scale

        ep_cost = pl.CostEstimate(
            flops=3 * m_pad * Cout, transcendentals=0,
            bytes_accessed=2 * m_pad * Cout * isz + 4 * Cout * 4)
        y = pl.pallas_call(
            _scale_shift_act_kernel,
            grid=(grid_m,),
            in_specs=[y_spec, row_spec, row_spec],
            out_specs=y_spec,
            out_shape=jax.ShapeDtypeStruct((m_pad, Cout), COMPUTE_DTYPE),
            compiler_params=cparams,
            cost_estimate=ep_cost,
        )(y_pre, scale, shift)

    return y[:M].reshape(N, Ho, Wo, Cout)


def final_conv_layer(x_nhwc, w, b):
    """Final Conv2d(k=4, s=1, p=2), Cout=1: lane-dense (Cout, M) layout.

    (1, K) @ (K, TM) tiles give unmasked full-lane stores, and the (1, M) result
    reshapes directly into NCHW (N, 1, Ho, Wo) with no extra transpose pass.
    """
    Cout, Cin, kh, kw = w.shape
    taps, (N, Ho, Wo, _) = _conv_taps(x_nhwc, kh, kw, stride=1, pad=2)
    patches_t = _patches_km(taps, (N, Ho, Wo, Cin)).astype(COMPUTE_DTYPE)  # (K, M)
    K, M = patches_t.shape
    tm, grid_m, m_pad = _m_tiling(M)
    if m_pad != M:
        patches_t = jnp.pad(patches_t, ((0, 0), (0, m_pad - M)))
    w_row = jnp.transpose(w, (2, 3, 1, 0)).reshape(K, Cout).T.astype(COMPUTE_DTYPE)

    _, vmem_limit = _tpu_budget()
    isz = jnp.dtype(COMPUTE_DTYPE).itemsize
    cost = pl.CostEstimate(
        flops=2 * m_pad * K * Cout, transcendentals=0,
        bytes_accessed=m_pad * K * isz + K * Cout * isz + m_pad * Cout * 4)

    y = pl.pallas_call(
        _convT_bias_kernel,
        grid=(grid_m,),
        in_specs=[pl.BlockSpec((K, tm), lambda i: (0, i)),
                  pl.BlockSpec((Cout, K), lambda i: (0, 0)),
                  pl.BlockSpec((Cout, 1), lambda i: (0, 0))],
        out_specs=pl.BlockSpec((Cout, tm), lambda i: (0, i)),
        out_shape=jax.ShapeDtypeStruct((Cout, m_pad), jnp.float32),
        compiler_params=pltpu.CompilerParams(
            dimension_semantics=("parallel",), vmem_limit_bytes=vmem_limit),
        cost_estimate=cost,
    )(patches_t, w_row, b.reshape(Cout, 1).astype(jnp.float32))

    # (Cout, M) -> (N, Cout, Ho, Wo); for Cout==1 this is a pure reshape (NCHW).
    return jnp.transpose(y[:, :M].reshape(Cout, N, Ho, Wo), (1, 0, 2, 3))


def avg_pool_3x3_s2(x_nhwc):
    """AvgPool2d(3, stride=2, padding=1, count_include_pad=False); lane-dense (C, M)."""
    N, H, W, C = x_nhwc.shape
    x_pad = jnp.pad(x_nhwc.astype(COMPUTE_DTYPE), ((0, 0), (1, 1), (1, 1), (0, 0)))
    Ho = (H - 1) // 2 + 1
    Wo = (W - 1) // 2 + 1
    taps = [x_pad[:, dy:dy + 2 * Ho:2, dx:dx + 2 * Wo:2, :]
            for dy in range(3) for dx in range(3)]
    p = jnp.moveaxis(jnp.stack(taps, axis=0), -1, 1)           # (9, C, N, Ho, Wo)
    M = N * Ho * Wo
    p = p.reshape(9, C, M)
    tm, grid_m, m_pad = _m_tiling(M)
    if m_pad != M:
        p = jnp.pad(p, ((0, 0), (0, 0), (0, m_pad - M)))

    _, vmem_limit = _tpu_budget()
    isz = jnp.dtype(COMPUTE_DTYPE).itemsize
    cost = pl.CostEstimate(flops=10 * m_pad * C, transcendentals=0,
                           bytes_accessed=10 * m_pad * C * isz)
    kern = functools.partial(_avgpool_kernel, tm=tm, ho=Ho, wo=Wo, h=H, w=W)
    y = pl.pallas_call(
        kern,
        grid=(grid_m,),
        in_specs=[pl.BlockSpec((9, C, tm), lambda i: (0, 0, i))],
        out_specs=pl.BlockSpec((C, tm), lambda i: (0, i)),
        out_shape=jax.ShapeDtypeStruct((C, m_pad), COMPUTE_DTYPE),
        compiler_params=pltpu.CompilerParams(
            dimension_semantics=("parallel",), vmem_limit_bytes=vmem_limit),
        cost_estimate=cost,
    )(p)
    return jnp.transpose(y[:, :M].reshape(C, N, Ho, Wo), (1, 2, 3, 0))   # -> NHWC


# ----------------------------- model -----------------------------

def _layer_configs(input_nc, ndf, n_layers):
    cfgs = []
    nf = ndf
    cfgs.append((input_nc, nf, 2, False, True))               # conv + lrelu
    for _ in range(1, n_layers):
        nf_prev, nf = nf, min(nf * 2, 512)
        cfgs.append((nf_prev, nf, 2, True, True))             # conv + bn + lrelu
    nf_prev, nf = nf, min(nf * 2, 512)
    cfgs.append((nf_prev, nf, 1, True, True))                  # conv + bn + lrelu
    cfgs.append((nf, 1, 1, False, False))                      # final conv
    return cfgs


def init_params(key, input_nc, ndf, n_layers, num_D):
    cfgs = _layer_configs(input_nc, ndf, n_layers)
    params = []
    for _ in range(num_D):
        d_params = []
        for (cin, cout, stride, bn, act) in cfgs:
            key, k1, k2, k3, k4 = jax.random.split(key, 5)
            w = 0.02 * jax.random.normal(k1, (cout, cin, 4, 4), jnp.float32)
            b = 0.01 * jax.random.normal(k2, (cout,), jnp.float32)
            gb = None
            if bn:
                gamma = 1.0 + 0.1 * jax.random.normal(k3, (cout,), jnp.float32)
                beta = 0.1 * jax.random.normal(k4, (cout,), jnp.float32)
                gb = (gamma, beta)
            d_params.append(dict(w=w, b=b, gb=gb, stride=stride, act=act))
        params.append(d_params)
    return params


def multiscale_discriminator_forward(params, x_nchw, num_D):
    """Returns list of [output] per scale (getIntermFeat=False), outputs NCHW."""
    x = jnp.transpose(x_nchw, (0, 2, 3, 1)).astype(jnp.float32)   # NCHW -> NHWC
    results = []
    x_ds = x
    for i in range(num_D):
        d_params = params[num_D - 1 - i]
        h = x_ds
        for lp in d_params[:-1]:
            h = conv_layer(h, lp["w"], lp["b"], lp["gb"], lp["stride"], lp["act"])
        last = d_params[-1]                                    # Cout=1, s=1, no BN
        results.append([final_conv_layer(h, last["w"], last["b"])])
        if i != num_D - 1:
            x_ds = avg_pool_3x3_s2(x_ds)
    return results


# ----------------------------- plain-JAX reference (sanity check) -----------------------------

def _ref_conv(x_nhwc, w, b, gb, stride, act):
    wk = jnp.transpose(w, (2, 3, 1, 0))
    y = lax.conv_general_dilated(
        x_nhwc, wk, (stride, stride), ((2, 2), (2, 2)),
        dimension_numbers=("NHWC", "HWIO", "NHWC"))
    y = y + b.reshape(1, 1, 1, -1)
    if gb is not None:
        mean = jnp.mean(y, axis=(0, 1, 2), keepdims=True)
        var = jnp.mean((y - mean) ** 2, axis=(0, 1, 2), keepdims=True)
        y = (y - mean) * lax.rsqrt(var + BN_EPS)
        y = y * gb[0].reshape(1, 1, 1, -1) + gb[1].reshape(1, 1, 1, -1)
    if act:
        y = jnp.where(y > 0, y, LRELU_SLOPE * y)
    return y


def _ref_avgpool(x_nhwc):
    pads = ((0, 0), (1, 1), (1, 1), (0, 0))
    s = lax.reduce_window(x_nhwc, 0.0, lax.add, (1, 3, 3, 1), (1, 2, 2, 1), pads)
    ones = jnp.ones(x_nhwc.shape[:3] + (1,), x_nhwc.dtype)
    c = lax.reduce_window(ones, 0.0, lax.add, (1, 3, 3, 1), (1, 2, 2, 1), pads)
    return s / c


def _ref_forward(params, x_nchw, num_D):
    x = jnp.transpose(x_nchw, (0, 2, 3, 1)).astype(jnp.float32)
    results = []
    x_ds = x
    for i in range(num_D):
        d_params = params[num_D - 1 - i]
        h = x_ds
        for lp in d_params:
            h = _ref_conv(h, lp["w"], lp["b"], lp["gb"], lp["stride"], lp["act"])
        results.append([jnp.transpose(h, (0, 3, 1, 2))])
        if i != num_D - 1:
            x_ds = _ref_avgpool(x_ds)
    return results


# ----------------------------- main -----------------------------

if __name__ == "__main__":
    # Small, deterministic config consistent with the module's constructor.
    input_nc, ndf, n_layers, num_D = 4, 8, 3, 3
    key = jax.random.PRNGKey(0)
    key, kx, kp = jax.random.split(key, 3)
    x = jax.random.normal(kx, (2, input_nc, 16, 16), jnp.float32)   # NCHW input

    params = init_params(kp, input_nc, ndf, n_layers, num_D)

    outs = multiscale_discriminator_forward(params, x, num_D)
    outs = jax.block_until_ready(outs)

    # Sanity check against a plain-JAX/XLA reference.  Tolerance is bf16-level
    # (MXU operands and intermediate activations are bf16); the relative-L2
    # check is tight enough to catch any patch/weight layout bug (~100% error).
    refs = _ref_forward(params, x, num_D)
    for o_scale, r_scale in zip(outs, refs):
        for o, r in zip(o_scale, r_scale):
            assert o.shape == r.shape, (o.shape, r.shape)
            assert bool(jnp.all(jnp.isfinite(o)))
            rel = float(jnp.linalg.norm((o - r).ravel()) /
                        (jnp.linalg.norm(r.ravel()) + 1e-8))
            assert rel < 8e-2, f"relative L2 error too large: {rel}"

    print("KERNEL_OK")
</pallas_src>

<mosaic_0001>
module attributes {stable_mosaic.version = 11 : i64} {
  func.func @_conv_bias_act_kernel(%arg0: i32, %arg1: memref<256x64xbf16, #tpu.memory_space<vmem>>, %arg2: memref<64x8xbf16, #tpu.memory_space<vmem>>, %arg3: memref<1x8xf32, #tpu.memory_space<vmem>>, %arg4: memref<256x8xbf16, #tpu.memory_space<vmem>>) attributes {dimension_semantics = [#tpu.dimension_semantics<parallel>], iteration_bounds = array<i64: 1>, scalar_prefetch = 0 : i64, scratch_operands = 0 : i64, tpu.core_type = #tpu.core_type<tc>, window_params = [{transform_indices = @transform_0, window_bounds = array<i64: 256, 64>}, {pipeline_mode = #tpu.pipeline_mode<synchronous>, transform_indices = @transform_1, window_bounds = array<i64: 64, 8>}, {pipeline_mode = #tpu.pipeline_mode<synchronous>, transform_indices = @transform_2, window_bounds = array<i64: 1, 8>}, {transform_indices = @transform_3, window_bounds = array<i64: 256, 8>}]} {
    %c0 = arith.constant 0 : index
    %c0_0 = arith.constant 0 : index
    %0 = vector.load %arg1[%c0, %c0_0] : memref<256x64xbf16, #tpu.memory_space<vmem>>, vector<256x64xbf16>
    %c0_1 = arith.constant 0 : index
    %c0_2 = arith.constant 0 : index
    %1 = vector.load %arg2[%c0_1, %c0_2] : memref<64x8xbf16, #tpu.memory_space<vmem>>, vector<64x8xbf16>
    %cst = arith.constant dense<0.000000e+00> : vector<256x8xf32>
    %2 = tpu.matmul %0, %1, %cst {dimension_numbers = #tpu.dot_dimension_numbers<[1], [0], [0], [1], [0, 0, 1, 1], [], []>} : vector<256x64xbf16>, vector<64x8xbf16>, vector<256x8xf32> -> vector<256x8xf32>
    %c0_3 = arith.constant 0 : index
    %c0_4 = arith.constant 0 : index
    %3 = vector.load %arg3[%c0_3, %c0_4] : memref<1x8xf32, #tpu.memory_space<vmem>>, vector<1x8xf32>
    %4 = vector.broadcast %3 : vector<1x8xf32> to vector<256x8xf32>
    %5 = arith.addf %2, %4 : vector<256x8xf32>
    %cst_5 = arith.constant 0.000000e+00 : f32
    %6 = vector.broadcast %cst_5 : f32 to vector<256x8xf32>
    %7 = arith.cmpf ogt, %5, %6 : vector<256x8xf32>
    %cst_6 = arith.constant 2.000000e-01 : f32
    %8 = vector.broadcast %cst_6 : f32 to vector<256x8xf32>
    %9 = arith.mulf %8, %5 : vector<256x8xf32>
    %10 = arith.select %7, %5, %9 : vector<256x8xi1>, vector<256x8xf32>
    %11 = arith.truncf %10 : vector<256x8xf32> to vector<256x8xbf16>
    %c0_7 = arith.constant 0 : index
    %c0_8 = arith.constant 0 : index
    %12 = vector.load %arg4[%c0_7, %c0_8] : memref<256x8xbf16, #tpu.memory_space<vmem>>, vector<256x8xbf16>
    tpu.vector_store %arg4[%c0_7, %c0_8], %11 {strides = array<i32>} : memref<256x8xbf16, #tpu.memory_space<vmem>>, vector<256x8xbf16>,
    return
  }
  func.func @transform_0(%arg0: i32) -> (i32, i32) {
    %c0_i32 = arith.constant 0 : i32
    %c0_i32_0 = arith.constant 0 : i32
    return %arg0, %c0_i32 : i32, i32
  }
  func.func @transform_1(%arg0: i32) -> (i32, i32) {
    %c0_i32 = arith.constant 0 : i32
    %c0_i32_0 = arith.constant 0 : i32
    %c0_i32_1 = arith.constant 0 : i32
    return %c0_i32, %c0_i32_0 : i32, i32
  }
  func.func @transform_2(%arg0: i32) -> (i32, i32) {
    %c0_i32 = arith.constant 0 : i32
    %c0_i32_0 = arith.constant 0 : i32
    %c0_i32_1 = arith.constant 0 : i32
    return %c0_i32, %c0_i32_0 : i32, i32
  }
  func.func @transform_3(%arg0: i32) -> (i32, i32) {
    %c0_i32 = arith.constant 0 : i32
    %c0_i32_0 = arith.constant 0 : i32
    return %arg0, %c0_i32 : i32, i32
  }
}

</mosaic_0001>

<bundles_post_ra>
// kernel: tpu_custom_call.1
= control target key start
LH: loop header
LB: loop body
LE: loop exit
PB: predicated region body
PF: predicated region fallthrough
CT: control target
= control target key end

     0   :  { %vm166_vm0 = vcmask 523264   ;;  %vm600_vm3 = vcmask 60416   ;;  %s1089_s1 = inlined_call_operand.vmem [shape: bf16[64,8], index: 1, kind: input, shape index: {}]   ;;  %s1090_s0 = inlined_call_operand.vmem [shape: bf16[256,64], index: 0, kind: input, shape index: {}]   ;;  %s1091_s2 = inlined_call_operand.vmem [shape: f32[1,8], index: 2, kind: input, shape index: {}]   ;;  %s1092_s3 = inlined_call_operand.vmem [shape: bf16[256,8], index: 3, kind: output, shape index: {}]  }
   0x1   :  { %v806_v0 = vld [vmem:[%s1089_s1 + $0x18] sm:$0xff]   ;;  %v807_v1 = vld [vmem:[%s1089_s1 + $0x10] sm:$0xff]   ;;  %v808_v2 = vld [vmem:[%s1089_s1 + $0x8] sm:$0xff]  }
   0x2   :  { %758 = vmatprep.subr.bf16.mxu0 %v806_v0  ;;  %798 = vmatprep.subr.bf16.mxu1 %v806_v0  ;;  %v810_v3 = vld [vmem:[%s1090_s0] sm:$0xff]   ;;  %v812_v6 = vld [vmem:[%s1090_s0 + $0x8] sm:$0xff]   ;;  %v814_v8 = vld [vmem:[%s1090_s0 + $0x10] sm:$0xff]  }
   0x3   :  { %759 = vmatpush3.bf16.msra.mxu0 %v806_v0  ;;  %802 = vmatpush3.bf16.msra.mxu1 %v806_v0  ;;  %v811_v4 = vld [vmem:[%s1090_s0 + $0x40] sm:$0xff]   ;;  %v813_v7 = vld [vmem:[%s1090_s0 + $0x48] sm:$0xff]   ;;  %v815_v9 = vld [vmem:[%s1090_s0 + $0x50] sm:$0xff]  }
   0x4   :  { %760 = vmatprep.subr.bf16.mxu0 %v807_v1  ;;  %799 = vmatprep.subr.bf16.mxu1 %v807_v1  ;;  %v809_v5 = vld [vmem:[%s1089_s1] sm:$0xff]   ;;  %v816_v10 = vld [vmem:[%s1090_s0 + $0x18] sm:$0xff]   ;;  %v820_v14 = vld [vmem:[%s1090_s0 + $0x28] sm:$0xff]  }
   0x5   :  { %766 = vmatprep.mubr.msk.bf16.mxu0 %vm166_vm0, %v810_v3  ;;  %782 = vmatprep.mubr.msk.bf16.mxu1 %vm166_vm0, %v811_v4  ;;  %v817_v11 = vld [vmem:[%s1090_s0 + $0x58] sm:$0xff]   ;;  %v818_v12 = vld [vmem:[%s1090_s0 + $0x20] sm:$0xff]   ;;  %v821_v15 = vld [vmem:[%s1090_s0 + $0x68] sm:$0xff]  }
   0x6   :  { %v819_v13 = vld [vmem:[%s1090_s0 + $0x60] sm:$0xff]   ;;  %v822_v16 = vld [vmem:[%s1090_s0 + $0x30] sm:$0xff]   ;;  %v824_v18 = vld [vmem:[%s1090_s0 + $0x38] sm:$0xff]  }
   0x7   :  { %761 = vmatpush3.bf16.msra.mxu0 %v807_v1  ;;  %803 = vmatpush3.bf16.msra.mxu1 %v807_v1  ;;  %v823_v17 = vld [vmem:[%s1090_s0 + $0x70] sm:$0xff]   ;;  %v825_v19 = vld [vmem:[%s1090_s0 + $0x78] sm:$0xff]   ;;  %v925_v20 = vld [vmem:[%s1091_s2] ss:$0 sm:$0xff] }
   0x8   :  { %762 = vmatprep.subr.bf16.mxu0 %v808_v2  ;;  %800 = vmatprep.subr.bf16.mxu1 %v808_v2 }
   0xb   :  { %763 = vmatpush3.bf16.msra.mxu0 %v808_v2  ;;  %804 = vmatpush3.bf16.msra.mxu1 %v808_v2 }
   0xc   :  { %764 = vmatprep.subr.bf16.mxu0 %v809_v5  ;;  %801 = vmatprep.subr.bf16.mxu1 %v809_v5 }
   0xf   :  { %765 = vmatpush3.bf16.msra.mxu0 %v809_v5  ;;  %805 = vmatpush3.bf16.msra.mxu1 %v809_v5 }
  0x12   :  { %767 = vmatmul.mubr.msk.bf16.vlgmr.msra.gmra.mxu0 %vm166_vm0, %v812_v6  ;;  %783 = vmatmul.mubr.msk.bf16.vlgmr.msra.gmra.mxu1 %vm166_vm0, %v813_v7 }
  0x13   :  { %770 = vmatprep.mubr.msk.bf16.mxu0 %vm166_vm0, %v814_v8  ;;  %786 = vmatprep.mubr.msk.bf16.mxu1 %vm166_vm0, %v815_v9 }
  0x1a   :  { %771 = vmatmul.mubr.msk.bf16.gmra.mxu0 %vm166_vm0, %v816_v10  ;;  %787 = vmatmul.mubr.msk.bf16.gmra.mxu1 %vm166_vm0, %v817_v11 }
  0x1b   :  { %774 = vmatprep.mubr.msk.bf16.mxu0 %vm166_vm0, %v818_v12  ;;  %790 = vmatprep.mubr.msk.bf16.mxu1 %vm166_vm0, %v819_v13 }
  0x22   :  { %775 = vmatmul.mubr.msk.bf16.gmra.mxu0 %vm166_vm0, %v820_v14  ;;  %791 = vmatmul.mubr.msk.bf16.gmra.mxu1 %vm166_vm0, %v821_v15 }
  0x23   :  { %778 = vmatprep.mubr.msk.bf16.mxu0 %vm166_vm0, %v822_v16  ;;  %794 = vmatprep.mubr.msk.bf16.mxu1 %vm166_vm0, %v823_v17 }
  0x2a   :  { %779 = vmatmul.mubr.msk.bf16.gmra.mxu0 %vm166_vm0, %v824_v18  ;;  %795 = vmatmul.mubr.msk.bf16.gmra.mxu1 %vm166_vm0, %v825_v19 }
  0xd2   :  { %v768_v21 = vpop.f32.mrf.mxu0  ;;  %v784_v22 = vpop.f32.mrf.mxu1 }
  0xd3   :  { %v258_v23 = vadd.f32 %v768_v21, %v925_v20  ;;  %v322_v24 = vadd.f32 %v784_v22, %v925_v20 }
  0xd4   :  { %v249_v25 = vpop.f32.mrf.mxu0  ;;  %v313_v26 = vpop.f32.mrf.mxu1 }
  0xd5   :  { %vm378_vm1 = vcmp.gt.f32.partialorder %v258_v23, 0.0  ;;  %v410_v27 = vmul.f32 0.2, %v258_v23  ;;  %vm394_vm2 = vcmp.gt.f32.partialorder %v322_v24, 0.0  ;;  %v426_v28 = vmul.f32 0.2, %v322_v24 }
  0xd6   :  { %v250_v29 = vadd.f32 %v925_v20, %v249_v25  ;;  %v314_v30 = vadd.f32 %v925_v20, %v313_v26  ;;  %v769_v31 = vpop.f32.mrf.mxu0  ;;  %v785_v32 = vpop.f32.mrf.mxu1 }
  0xd7   :  { %v442_v33 = vsel %vm378_vm1, %v258_v23, %v410_v27  ;;  %v458_v34 = vsel %vm394_vm2, %v322_v24, %v426_v28  ;;  %v261_v35 = vadd.f32 %v769_v31, %v925_v20  ;;  %v325_v36 = vadd.f32 %v785_v32, %v925_v20 }
  0xd8   :  { %v708_v37 = vpack.c.bf16 %v442_v33, %v442_v33  ;;  %v724_v38 = vpack.c.bf16 %v458_v34, %v458_v34  ;;  %vm376_vm4 = vcmp.gt.f32.partialorder %v250_v29, 0.0  ;;  %v408_v39 = vmul.f32 0.2, %v250_v29  ;;  %v252_v40 = vpop.f32.mrf.mxu0  ;;  %v316_v41 = vpop.f32.mrf.mxu1 }
  0xd9   :  { %vm392_vm5 = vcmp.gt.f32.partialorder %v314_v30, 0.0  ;;  %v424_v42 = vmul.f32 0.2, %v314_v30  ;;  %vm379_vm6 = vcmp.gt.f32.partialorder %v261_v35, 0.0  ;;  %v411_v43 = vmul.f32 0.2, %v261_v35 }
  0xda   :  { %603 = vst.msk [vmem:[%s1092_s3 + $0x8] sm:$0xf] %vm600_vm3, %v708_v37  ;;  %619 = vst.msk [vmem:[%s1092_s3 + $0x48] sm:$0xf] %vm600_vm3, %v724_v38  ;;  %v440_v44 = vsel %vm376_vm4, %v250_v29, %v408_v39  ;;  %vm395_vm7 = vcmp.gt.f32.partialorder %v325_v36, 0.0  ;;  %v253_v46 = vadd.f32 %v925_v20, %v252_v40  ;;  %v772_v47 = vpop.f32.mrf.mxu0  ;;  %v788_v48 = vpop.f32.mrf.mxu1  ;;  %v317_v52 = vadd.f32 %v925_v20, %v316_v41 }
  0xdb   :  { %v427_v45 = vmul.f32 0.2, %v325_v36  ;;  %v706_v49 = vpack.c.bf16 %v440_v44, %v440_v44  ;;  %v456_v50 = vsel %vm392_vm5, %v314_v30, %v424_v42  ;;  %v443_v51 = vsel %vm379_vm6, %v261_v35, %v411_v43 }
  0xdc   :  { %v722_v53 = vpack.c.bf16 %v456_v50, %v456_v50  ;;  %v709_v54 = vpack.c.bf16 %v443_v51, %v443_v51  ;;  %vm377_vm8 = vcmp.gt.f32.partialorder %v253_v46, 0.0  ;;  %v265_v56 = vpop.f32.mrf.mxu0  ;;  %v329_v57 = vpop.f32.mrf.mxu1  ;;  %v409_v59 = vmul.f32 0.2, %v253_v46 }
  0xdd   :  { %v459_v55 = vsel %vm395_vm7, %v325_v36, %v427_v45  ;;  %601 = vst.msk [vmem:[%s1092_s3] sm:$0xf] %vm600_vm3, %v706_v49  ;;  %vm393_vm9 = vcmp.gt.f32.partialorder %v317_v52, 0.0  ;;  %v425_v60 = vmul.f32 0.2, %v317_v52  ;;  %v274_v61 = vadd.f32 %v772_v47, %v925_v20 }
  0xde   :  { %v725_v58 = vpack.c.bf16 %v459_v55, %v459_v55  ;;  %617 = vst.msk [vmem:[%s1092_s3 + $0x40] sm:$0xf] %vm600_vm3, %v722_v53  ;;  %604 = vst.msk [vmem:[%s1092_s3 + $0xc] sm:$0xf] %vm600_vm3, %v709_v54  ;;  %v338_v62 = vadd.f32 %v788_v48, %v925_v20  ;;  %v266_v63 = vadd.f32 %v925_v20, %v265_v56  ;;  %v773_v1 = vpop.f32.mrf.mxu0  ;;  %v789_v2 = vpop.f32.mrf.mxu1 }
  0xdf   :  { %v330_v0 = vadd.f32 %v925_v20, %v329_v57  ;;  %v441_v3 = vsel %vm377_vm8, %v253_v46, %v409_v59  ;;  %v457_v4 = vsel %vm393_vm9, %v317_v52, %v425_v60  ;;  %v277_v5 = vadd.f32 %v773_v1, %v925_v20 }
  0xe0   :  { %620 = vst.msk [vmem:[%s1092_s3 + $0x4c] sm:$0xf] %vm600_vm3, %v725_v58  ;;  %v341_v6 = vadd.f32 %v789_v2, %v925_v20  ;;  %v707_v7 = vpack.c.bf16 %v441_v3, %v441_v3  ;;  %v723_v8 = vpack.c.bf16 %v457_v4, %v457_v4  ;;  %vm382_vm10 = vcmp.gt.f32.partialorder %v274_v61, 0.0  ;;  %v268_v10 = vpop.f32.mrf.mxu0  ;;  %v332_v11 = vpop.f32.mrf.mxu1 }
  0xe1   :  { %v414_v9 = vmul.f32 0.2, %v274_v61  ;;  %vm398_vm11 = vcmp.gt.f32.partialorder %v338_v62, 0.0  ;;  %v430_v12 = vmul.f32 0.2, %v338_v62  ;;  %vm380_vm12 = vcmp.gt.f32.partialorder %v266_v63, 0.0 }
  0xe2   :  { %v412_v13 = vmul.f32 0.2, %v266_v63  ;;  %602 = vst.msk [vmem:[%s1092_s3 + $0x4] sm:$0xf] %vm600_vm3, %v707_v7  ;;  %618 = vst.msk [vmem:[%s1092_s3 + $0x44] sm:$0xf] %vm600_vm3, %v723_v8  ;;  %v776_v16 = vpop.f32.mrf.mxu0  ;;  %v792_v17 = vpop.f32.mrf.mxu1  ;;  %v269_v31 = vadd.f32 %v925_v20, %v268_v10  ;;  %v333_v33 = vadd.f32 %v925_v20, %v332_v11 }
  0xe3   :  { %v446_v14 = vsel %vm382_vm10, %v274_v61, %v414_v9  ;;  %vm396_vm13 = vcmp.gt.f32.partialorder %v330_v0, 0.0  ;;  %v428_v15 = vmul.f32 0.2, %v330_v0  ;;  %vm383_vm14 = vcmp.gt.f32.partialorder %v277_v5, 0.0 }
  0xe4   :  { %v712_v18 = vpack.c.bf16 %v446_v14, %v446_v14  ;;  %v462_v19 = vsel %vm398_vm11, %v338_v62, %v430_v12  ;;  %v444_v21 = vsel %vm380_vm12, %v266_v63, %v412_v13  ;;  %v415_v22 = vmul.f32 0.2, %v277_v5  ;;  %v281_v26 = vpop.f32.mrf.mxu0  ;;  %v345_v27 = vpop.f32.mrf.mxu1 }
  0xe5   :  { %v728_v23 = vpack.c.bf16 %v462_v19, %v462_v19  ;;  %v710_v24 = vpack.c.bf16 %v444_v21, %v444_v21  ;;  %v460_v25 = vsel %vm396_vm13, %v330_v0, %v428_v15  ;;  %vm399_vm15 = vcmp.gt.f32.partialorder %v341_v6, 0.0 }
  0xe6   :  { %607 = vst.msk [vmem:[%s1092_s3 + $0x18] sm:$0xf] %vm600_vm3, %v712_v18  ;;  %v726_v28 = vpack.c.bf16 %v460_v25, %v460_v25  ;;  %v447_v29 = vsel %vm383_vm14, %v277_v5, %v415_v22  ;;  %v431_v30 = vmul.f32 0.2, %v341_v6  ;;  %v290_v34 = vadd.f32 %v776_v16, %v925_v20  ;;  %v777_v36 = vpop.f32.mrf.mxu0  ;;  %v793_v37 = vpop.f32.mrf.mxu1 }
  0xe7   :  { %623 = vst.msk [vmem:[%s1092_s3 + $0x58] sm:$0xf] %vm600_vm3, %v728_v23  ;;  %605 = vst.msk [vmem:[%s1092_s3 + $0x10] sm:$0xf] %vm600_vm3, %v710_v24  ;;  %v713_v32 = vpack.c.bf16 %v447_v29, %v447_v29  ;;  %v354_v35 = vadd.f32 %v792_v17, %v925_v20  ;;  %vm381_vm0 = vcmp.gt.f32.partialorder %v269_v31, 0.0  ;;  %v282_v40 = vadd.f32 %v925_v20, %v281_v26 }
  0xe8   :  { %621 = vst.msk [vmem:[%s1092_s3 + $0x50] sm:$0xf] %vm600_vm3, %v726_v28  ;;  %v463_v38 = vsel %vm399_vm15, %v341_v6, %v431_v30  ;;  %v413_v39 = vmul.f32 0.2, %v269_v31  ;;  %vm397_vm1 = vcmp.gt.f32.partialorder %v333_v33, 0.0  ;;  %vm386_vm2 = vcmp.gt.f32.partialorder %v290_v34, 0.0  ;;  %v284_v43 = vpop.f32.mrf.mxu0  ;;  %v348_v44 = vpop.f32.mrf.mxu1 }
  0xe9   :  { %608 = vst.msk [vmem:[%s1092_s3 + $0x1c] sm:$0xf] %vm600_vm3, %v713_v32  ;;  %v729_v41 = vpack.c.bf16 %v463_v38, %v463_v38  ;;  %v429_v42 = vmul.f32 0.2, %v333_v33  ;;  %v418_v46 = vmul.f32 0.2, %v290_v34  ;;  %v346_v56 = vadd.f32 %v925_v20, %v345_v27 }
  0xea   :  { %v445_v45 = vsel %vm381_vm0, %v269_v31, %v413_v39  ;;  %vm402_vm4 = vcmp.gt.f32.partialorder %v354_v35, 0.0  ;;  %v434_v47 = vmul.f32 0.2, %v354_v35  ;;  %vm384_vm5 = vcmp.gt.f32.partialorder %v282_v40, 0.0  ;;  %v780_v51 = vpop.f32.mrf.mxu0  ;;  %v796_v52 = vpop.f32.mrf.mxu1 }
  0xeb   :  { %624 = vst.msk [vmem:[%s1092_s3 + $0x5c] sm:$0xf] %vm600_vm3, %v729_v41  ;;  %v711_v48 = vpack.c.bf16 %v445_v45, %v445_v45  ;;  %v461_v49 = vsel %vm397_vm1, %v333_v33, %v429_v42  ;;  %v416_v50 = vmul.f32 0.2, %v282_v40  ;;  %v450_v54 = vsel %vm386_vm2, %v290_v34, %v418_v46 }
  0xec   :  { %v727_v53 = vpack.c.bf16 %v461_v49, %v461_v49  ;;  %v466_v55 = vsel %vm402_vm4, %v354_v35, %v434_v47  ;;  %v716_v57 = vpack.c.bf16 %v450_v54, %v450_v54  ;;  %v293_v60 = vadd.f32 %v777_v36, %v925_v20  ;;  %v297_v61 = vpop.f32.mrf.mxu0  ;;  %v361_v1 = vpop.f32.mrf.mxu1 }
  0xed   :  { %606 = vst.msk [vmem:[%s1092_s3 + $0x14] sm:$0xf] %vm600_vm3, %v711_v48  ;;  %v732_v58 = vpack.c.bf16 %v466_v55, %v466_v55  ;;  %v448_v59 = vsel %vm384_vm5, %v282_v40, %v416_v50  ;;  %vm400_vm6 = vcmp.gt.f32.partialorder %v346_v56, 0.0  ;;  %v432_v63 = vmul.f32 0.2, %v346_v56 }
  0xee   :  { %622 = vst.msk [vmem:[%s1092_s3 + $0x54] sm:$0xf] %vm600_vm3, %v727_v53  ;;  %v714_v62 = vpack.c.bf16 %v448_v59, %v448_v59  ;;  %v357_v0 = vadd.f32 %v793_v37, %v925_v20  ;;  %611 = vst.msk [vmem:[%s1092_s3 + $0x28] sm:$0xf] %vm600_vm3, %v716_v57  ;;  %vm387_vm7 = vcmp.gt.f32.partialorder %v293_v60, 0.0  ;;  %v285_v3 = vadd.f32 %v925_v20, %v284_v43  ;;  %v781_v11 = vpop.f32.mrf.mxu0  ;;  %v797_v15 = vpop.f32.mrf.mxu1 }
  0xef   :  { %627 = vst.msk [vmem:[%s1092_s3 + $0x68] sm:$0xf] %vm600_vm3, %v732_v58  ;;  %v419_v2 = vmul.f32 0.2, %v293_v60  ;;  %v349_v4 = vadd.f32 %v925_v20, %v348_v44  ;;  %v464_v5 = vsel %vm400_vm6, %v346_v56, %v432_v63  ;;  %v306_v7 = vadd.f32 %v780_v51, %v925_v20 }
  0xf0   :  { %609 = vst.msk [vmem:[%s1092_s3 + $0x20] sm:$0xf] %vm600_vm3, %v714_v62  ;;  %vm403_vm8 = vcmp.gt.f32.partialorder %v357_v0, 0.0  ;;  %v435_v6 = vmul.f32 0.2, %v357_v0  ;;  %v730_v8 = vpack.c.bf16 %v464_v5, %v464_v5  ;;  %vm385_vm9 = vcmp.gt.f32.partialorder %v285_v3, 0.0  ;;  %v300_v28 = vpop.f32.mrf.mxu0  ;;  %v364_v31 = vpop.f32.mrf.mxu1 }
  0xf1   :  { %v451_v9 = vsel %vm387_vm7, %v293_v60, %v419_v2  ;;  %v417_v10 = vmul.f32 0.2, %v285_v3  ;;  %vm401_vm10 = vcmp.gt.f32.partialorder %v349_v4, 0.0  ;;  %v433_v14 = vmul.f32 0.2, %v349_v4 }
  0xf2   :  { %v717_v12 = vpack.c.bf16 %v451_v9, %v451_v9  ;;  %v467_v13 = vsel %vm403_vm8, %v357_v0, %v435_v6  ;;  %625 = vst.msk [vmem:[%s1092_s3 + $0x60] sm:$0xf] %vm600_vm3, %v730_v8  ;;  %vm390_vm11 = vcmp.gt.f32.partialorder %v306_v7, 0.0  ;;  %v422_v18 = vmul.f32 0.2, %v306_v7 }
  0xf3   :  { %v733_v16 = vpack.c.bf16 %v467_v13, %v467_v13  ;;  %v449_v17 = vsel %vm385_vm9, %v285_v3, %v417_v10  ;;  %v465_v21 = vsel %vm401_vm10, %v349_v4, %v433_v14  ;;  %v370_v22 = vadd.f32 %v796_v52, %v925_v20 }
  0xf4   :  { %612 = vst.msk [vmem:[%s1092_s3 + $0x2c] sm:$0xf] %vm600_vm3, %v717_v12  ;;  %v715_v19 = vpack.c.bf16 %v449_v17, %v449_v17  ;;  %v298_v23 = vadd.f32 %v925_v20, %v297_v61  ;;  %v731_v24 = vpack.c.bf16 %v465_v21, %v465_v21  ;;  %v454_v25 = vsel %vm390_vm11, %v306_v7, %v422_v18 }
  0xf5   :  { %628 = vst.msk [vmem:[%s1092_s3 + $0x6c] sm:$0xf] %vm600_vm3, %v733_v16  ;;  %v362_v26 = vadd.f32 %v925_v20, %v361_v1  ;;  %v309_v27 = vadd.f32 %v781_v11, %v925_v20  ;;  %v720_v29 = vpack.c.bf16 %v454_v25, %v454_v25  ;;  %vm406_vm12 = vcmp.gt.f32.partialorder %v370_v22, 0.0 }
  0xf6   :  { %610 = vst.msk [vmem:[%s1092_s3 + $0x24] sm:$0xf] %vm600_vm3, %v715_v19  ;;  %v438_v30 = vmul.f32 0.2, %v370_v22  ;;  %vm388_vm13 = vcmp.gt.f32.partialorder %v298_v23, 0.0  ;;  %v373_v36 = vadd.f32 %v797_v15, %v925_v20  ;;  %v301_v37 = vadd.f32 %v925_v20, %v300_v28 }
  0xf7   :  { %626 = vst.msk [vmem:[%s1092_s3 + $0x64] sm:$0xf] %vm600_vm3, %v731_v24  ;;  %v420_v32 = vmul.f32 0.2, %v298_v23  ;;  %vm404_vm14 = vcmp.gt.f32.partialorder %v362_v26, 0.0  ;;  %vm391_vm15 = vcmp.gt.f32.partialorder %v309_v27, 0.0  ;;  %v365_v41 = vadd.f32 %v925_v20, %v364_v31 }
  0xf8   :  { %v436_v33 = vmul.f32 0.2, %v362_v26  ;;  %615 = vst.msk [vmem:[%s1092_s3 + $0x38] sm:$0xf] %vm600_vm3, %v720_v29  ;;  %v470_v34 = vsel %vm406_vm12, %v370_v22, %v438_v30  ;;  %v423_v35 = vmul.f32 0.2, %v309_v27 }
  0xf9   :  { %v736_v38 = vpack.c.bf16 %v470_v34, %v470_v34  ;;  %v452_v39 = vsel %vm388_vm13, %v298_v23, %v420_v32  ;;  %vm407_vm0 = vcmp.gt.f32.partialorder %v373_v36, 0.0  ;;  %v439_v46 = vmul.f32 0.2, %v373_v36 }
  0xfa   :  { %v468_v40 = vsel %vm404_vm14, %v362_v26, %v436_v33  ;;  %v718_v42 = vpack.c.bf16 %v452_v39, %v452_v39  ;;  %v455_v44 = vsel %vm391_vm15, %v309_v27, %v423_v35  ;;  %vm389_vm1 = vcmp.gt.f32.partialorder %v301_v37, 0.0 }
  0xfb   :  { %v734_v43 = vpack.c.bf16 %v468_v40, %v468_v40  ;;  %631 = vst.msk [vmem:[%s1092_s3 + $0x78] sm:$0xf] %vm600_vm3, %v736_v38  ;;  %v721_v45 = vpack.c.bf16 %v455_v44, %v455_v44  ;;  %v421_v47 = vmul.f32 0.2, %v301_v37  ;;  %vm405_vm2 = vcmp.gt.f32.partialorder %v365_v41, 0.0 }
  0xfc   :  { %613 = vst.msk [vmem:[%s1092_s3 + $0x30] sm:$0xf] %vm600_vm3, %v718_v42  ;;  %v437_v20 = vmul.f32 0.2, %v365_v41  ;;  %v471_v48 = vsel %vm407_vm0, %v373_v36, %v439_v46 }
  0xfd   :  { %629 = vst.msk [vmem:[%s1092_s3 + $0x70] sm:$0xf] %vm600_vm3, %v734_v43  ;;  %616 = vst.msk [vmem:[%s1092_s3 + $0x3c] sm:$0xf] %vm600_vm3, %v721_v45  ;;  %v453_v49 = vsel %vm389_vm1, %v301_v37, %v421_v47  ;;  %v737_v50 = vpack.c.bf16 %v471_v48, %v471_v48 }
  0xfe   :  { %v719_v51 = vpack.c.bf16 %v453_v49, %v453_v49  ;;  %v469_v52 = vsel %vm405_vm2, %v365_v41, %v437_v20 }
  0xff   :  { %v735_v53 = vpack.c.bf16 %v469_v52, %v469_v52  ;;  %632 = vst.msk [vmem:[%s1092_s3 + $0x7c] sm:$0xf] %vm600_vm3, %v737_v50 }
 0x100   :  { %614 = vst.msk [vmem:[%s1092_s3 + $0x34] sm:$0xf] %vm600_vm3, %v719_v51 }
 0x101   :  { %630 = vst.msk [vmem:[%s1092_s3 + $0x74] sm:$0xf] %vm600_vm3, %v735_v53 }

</bundles_post_ra>
